<compile_context>
chip_gen: v5e
topology: v5e:2x2
jax: 0.10.0
libtpu: 0.0.40
codegen_flags: <defaults>
</compile_context>

<pallas_src>
import jax
import jax.numpy as jnp
from jax import lax
from jax.experimental import pallas as pl
from jax.experimental.pallas import tpu as pltpu


# ---------------------------------------------------------------------------
# helpers: tile selection + zero padding + VMEM budget
# ---------------------------------------------------------------------------
def _round_up(x, m):
    return (x + m - 1) // m * m


def _sublane_gran(dtype):
    itemsize = jnp.dtype(dtype).itemsize
    return max(8, 32 // max(itemsize, 1))


def _pick_tile(dim, pref, gran, big_gran=None):
    """Return (tile, padded_dim). tile divides padded_dim, is a multiple of
    `gran` (or `big_gran` when the dim actually needs tiling) and is <= pref
    whenever possible."""
    padded = _round_up(dim, gran)
    if padded <= pref:
        return padded, padded
    if big_gran is not None and big_gran > gran:
        gran = big_gran
        padded = _round_up(dim, gran)
    best = gran
    t = gran
    while t <= pref:
        if padded % t == 0:
            best = t
        t += gran
    return best, padded


def _pad_to(a, shape):
    pads = [(0, s - d) for d, s in zip(a.shape, shape)]
    if all(p == (0, 0) for p in pads):
        return a
    return jnp.pad(a, pads)


def _vmem_limit_bytes():
    """~3/4 of physical VMEM (96 MiB on v5e/v6e, 48 MiB on v7x)."""
    cap = 64 * 1024 * 1024  # conservative default (v7x-sized)
    try:
        info = pltpu.get_tpu_info()
        cap = int(getattr(info, "vmem_capacity_bytes", cap) or cap)
    except Exception:
        pass
    return max(32 * 1024 * 1024, (cap * 3) // 4)


# ---------------------------------------------------------------------------
# Kernel 1: tiled affine  y = x @ W.T (+ b)   (W consumed as [N, K])
# ---------------------------------------------------------------------------
def _make_linear_kernel(*, x_resident, has_bias, use_scratch, tk):
    def kernel(*refs):
        p = 0
        x_ref = refs[p]; p += 1
        w_ref = refs[p]; p += 1
        b_ref = None
        if has_bias:
            b_ref = refs[p]; p += 1
        o_ref = refs[p]; p += 1
        acc_ref = refs[p] if use_scratch else o_ref  # f32 out: acc into o_ref

        k = pl.program_id(2)
        nk = pl.num_programs(2)

        @pl.when(k == 0)
        def _():
            acc_ref[...] = jnp.zeros_like(acc_ref)

        if x_resident:
            x_blk = x_ref[:, pl.ds(pl.multiple_of(k * tk, tk), tk)]
        else:
            x_blk = x_ref[...]

        # x: (tm, tk), w: (tn, tk) -> contract last axes -> (tm, tn)  (MXU)
        acc_ref[...] += lax.dot_general(
            x_blk, w_ref[...],
            dimension_numbers=(((1,), (1,)), ((), ())),
            preferred_element_type=jnp.float32)

        if has_bias or use_scratch:
            @pl.when(k == nk - 1)
            def _():
                y = acc_ref[...]
                if has_bias:
                    y = y + b_ref[...]
                o_ref[...] = y.astype(o_ref.dtype)

    return kernel


def linear_forward(x, weight, bias=None, *,
                   tm_pref=256, tn_pref=1024, tk_pref=1024):
    """y = x @ weight.T + bias  (weight: [out, in], bias: [out] or None)."""
    B, K = x.shape
    N, K2 = weight.shape
    assert K == K2
    dtype = x.dtype
    itemsize = jnp.dtype(dtype).itemsize
    sub = _sublane_gran(dtype)
    has_bias = bias is not None
    use_scratch = dtype != jnp.float32

    vmem_limit = _vmem_limit_bytes()
    budget = (vmem_limit * 3) // 4  # leave headroom for Mosaic scratch

    tm, Bp = _pick_tile(B, tm_pref, sub)
    tn, Np = _pick_tile(N, tn_pref, 128, big_gran=256)
    tk, Kp = _pick_tile(K, tk_pref, 128, big_gran=256)

    # v7x has 2 TensorCores: make sure the "parallel" axes have >= 2 blocks.
    if (Bp // tm) * (Np // tn) == 1 and B >= 2 * sub:
        Bp = _round_up(B, 2 * sub)
        tm = Bp // 2

    def usage(x_res, tm_, tn_, tk_):
        u = 2 * tm_ * (Kp if x_res else tk_) * itemsize        # x (dbl-buffered)
        u += 2 * tn_ * tk_ * itemsize                          # W
        if has_bias:
            u += 2 * tn_ * itemsize                            # bias
        u += 2 * tm_ * tn_ * itemsize                          # out
        if use_scratch:
            u += tm_ * tn_ * 4                                 # f32 acc
        return u

    for _ in range(8):  # shrink (rarely needed) until streamed set fits
        if usage(False, tm, tn, tk) <= budget:
            break
        if tn >= tk and tn > 256:
            tn, Np = _pick_tile(N, tn // 2, 128, big_gran=256)
        elif tk > 256:
            tk, Kp = _pick_tile(K, tk // 2, 128, big_gran=256)
        elif tm > sub:
            tm, Bp = _pick_tile(B, max(tm // 2, sub), sub)
        else:
            break

    # Keep x resident across the whole (j, k) sweep when it fits VMEM.
    x_resident = usage(True, tm, tn, tk) <= budget

    xp = _pad_to(x, (Bp, Kp))
    wp = _pad_to(weight, (Np, Kp))
    operands = [xp, wp]
    in_specs = [
        (pl.BlockSpec((tm, Kp), lambda i, j, k: (i, 0)) if x_resident
         else pl.BlockSpec((tm, tk), lambda i, j, k: (i, k))),   # x
        pl.BlockSpec((tn, tk), lambda i, j, k: (j, k)),          # W [N, K]
    ]
    if has_bias:
        bp = _pad_to(jnp.asarray(bias).reshape(1, N), (1, Np))
        operands.append(bp)
        in_specs.append(pl.BlockSpec((1, tn), lambda i, j, k: (0, j)))

    grid = (Bp // tm, Np // tn, Kp // tk)
    x_reads = 1 if x_resident else (Np // tn)

    out = pl.pallas_call(
        _make_linear_kernel(x_resident=x_resident, has_bias=has_bias,
                            use_scratch=use_scratch, tk=tk),
        out_shape=jax.ShapeDtypeStruct((Bp, Np), dtype),
        grid_spec=pltpu.PrefetchScalarGridSpec(
            num_scalar_prefetch=0,
            grid=grid,
            in_specs=in_specs,
            out_specs=pl.BlockSpec((tm, tn), lambda i, j, k: (i, j)),
            scratch_shapes=([pltpu.VMEM((tm, tn), jnp.float32)]
                            if use_scratch else []),
        ),
        compiler_params=pltpu.CompilerParams(
            dimension_semantics=("parallel", "parallel", "arbitrary"),
            vmem_limit_bytes=int(vmem_limit),
        ),
        cost_estimate=pl.CostEstimate(
            flops=2 * Bp * Kp * Np,
            transcendentals=0,
            bytes_accessed=int((Bp * Kp * x_reads + Np * Kp * (Bp // tm)
                                + (Np if has_bias else 0) + Bp * Np) * itemsize),
        ),
    )(*operands)
    return out[:B, :N]


# ---------------------------------------------------------------------------
# Kernel 2 (fused): out[b, m] = sum_n C[b, m, n] * (x @ W.T + b)[b, n]
# y tiles stay in VMEM; no second pallas_call, no HBM round-trip of y.
# ---------------------------------------------------------------------------
def _make_linear_bmm_kernel(*, x_resident, has_bias, tk):
    def kernel(*refs):
        p = 0
        x_ref = refs[p]; p += 1
        w_ref = refs[p]; p += 1
        b_ref = None
        if has_bias:
            b_ref = refs[p]; p += 1
        c_ref = refs[p]; p += 1
        o_ref = refs[p]; p += 1
        y_acc = refs[p]; p += 1
        out_acc = refs[p]; p += 1

        j = pl.program_id(1)
        k = pl.program_id(2)
        nj = pl.num_programs(1)
        nk = pl.num_programs(2)

        @pl.when((j == 0) & (k == 0))
        def _():
            out_acc[...] = jnp.zeros_like(out_acc)

        @pl.when(k == 0)
        def _():
            y_acc[...] = jnp.zeros_like(y_acc)

        if x_resident:
            x_blk = x_ref[:, pl.ds(pl.multiple_of(k * tk, tk), tk)]
        else:
            x_blk = x_ref[...]

        # Accumulate the y tile: (tm, tk) x (tn, tk)^T -> (tm, tn)  (MXU)
        y_acc[...] += lax.dot_general(
            x_blk, w_ref[...],
            dimension_numbers=(((1,), (1,)), ((), ())),
            preferred_element_type=jnp.float32)

        # K epilogue: add bias and fold this N-tile into the C contraction.
        @pl.when(k == nk - 1)
        def _():
            y = y_acc[...]                              # (tm, tn) f32
            if has_bias:
                y = y + b_ref[...]
            # Keep y in f32 and upcast C (matches the f32 reference); VPU
            # multiply + lane reduction instead of a 1-wide batched matvec.
            c = c_ref[...].astype(jnp.float32)          # (tm, M, tn)
            out_acc[...] += jnp.sum(c * y[:, None, :], axis=-1)

        @pl.when((k == nk - 1) & (j == nj - 1))
        def _():
            o_ref[...] = out_acc[...].astype(o_ref.dtype)

    return kernel


def linear_bmm_forward(x, weight, bias, C, *,
                       tm_pref=256, tn_pref=512, tk_pref=512):
    """bmm(C, (x @ W.T + b).unsqueeze(-1)).squeeze(-1), fused in one kernel."""
    B, K = x.shape
    N, K2 = weight.shape
    Bc, M, Nc = C.shape
    assert K == K2 and Bc == B and Nc == N
    dtype = x.dtype
    itemsize = jnp.dtype(dtype).itemsize
    c_itemsize = jnp.dtype(C.dtype).itemsize
    sub = _sublane_gran(dtype)
    has_bias = bias is not None

    vmem_limit = _vmem_limit_bytes()
    budget = (vmem_limit * 3) // 4

    tm, Bp = _pick_tile(B, tm_pref, sub)
    # v7x has 2 TensorCores; only the batch axis is "parallel" here, so make
    # sure it has >= 2 blocks whenever B allows it.
    if Bp // tm == 1 and B >= 2 * sub:
        Bp = _round_up(B, 2 * sub)
        tm = Bp // 2
    tn, Np = _pick_tile(N, tn_pref, 128, big_gran=256)
    tk, Kp = _pick_tile(K, tk_pref, 128, big_gran=256)

    def usage(x_res, tm_, tn_, tk_):
        u = 2 * tm_ * (Kp if x_res else tk_) * itemsize        # x
        u += 2 * tn_ * tk_ * itemsize                          # W
        if has_bias:
            u += 2 * tn_ * itemsize                            # bias
        u += 2 * tm_ * M * tn_ * c_itemsize                    # C block
        u += 2 * tm_ * M * itemsize                            # out
        u += tm_ * tn_ * 4 + tm_ * M * 4                       # scratches
        return u

    # The double-buffered (tm, M, tn) C block is the first thing to overflow
    # VMEM (especially on v7x): shrink tn, then tk, then tm until it fits.
    for _ in range(16):
        if usage(False, tm, tn, tk) <= budget:
            break
        if tn > 256:
            tn, Np = _pick_tile(N, tn // 2, 128, big_gran=256)
        elif tk > 256:
            tk, Kp = _pick_tile(K, tk // 2, 128, big_gran=256)
        elif tm > sub:
            tm, Bp = _pick_tile(B, max(tm // 2, sub), sub)
        else:
            break

    x_resident = usage(True, tm, tn, tk) <= budget

    xp = _pad_to(x, (Bp, Kp))
    wp = _pad_to(weight, (Np, Kp))
    cp = _pad_to(C, (Bp, M, Np))
    operands = [xp, wp]
    in_specs = [
        (pl.BlockSpec((tm, Kp), lambda i, j, k: (i, 0)) if x_resident
         else pl.BlockSpec((tm, tk), lambda i, j, k: (i, k))),   # x
        pl.BlockSpec((tn, tk), lambda i, j, k: (j, k)),          # W [N, K]
    ]
    if has_bias:
        bp = _pad_to(jnp.asarray(bias).reshape(1, N), (1, Np))
        operands.append(bp)
        in_specs.append(pl.BlockSpec((1, tn), lambda i, j, k: (0, j)))
    operands.append(cp)
    in_specs.append(pl.BlockSpec((tm, M, tn), lambda i, j, k: (i, 0, j)))

    grid = (Bp // tm, Np // tn, Kp // tk)
    x_reads = 1 if x_resident else (Np // tn)

    out = pl.pallas_call(
        _make_linear_bmm_kernel(x_resident=x_resident, has_bias=has_bias,
                                tk=tk),
        out_shape=jax.ShapeDtypeStruct((Bp, M), dtype),
        grid_spec=pltpu.PrefetchScalarGridSpec(
            num_scalar_prefetch=0,
            grid=grid,
            in_specs=in_specs,
            out_specs=pl.BlockSpec((tm, M), lambda i, j, k: (i, 0)),
            scratch_shapes=[pltpu.VMEM((tm, tn), jnp.float32),
                            pltpu.VMEM((tm, M), jnp.float32)],
        ),
        compiler_params=pltpu.CompilerParams(
            dimension_semantics=("parallel", "arbitrary", "arbitrary"),
            vmem_limit_bytes=int(vmem_limit),
        ),
        cost_estimate=pl.CostEstimate(
            flops=2 * Bp * Kp * Np + 2 * Bp * M * Np,
            transcendentals=0,
            bytes_accessed=int((Bp * Kp * x_reads + Np * Kp * (Bp // tm)
                                + (Np if has_bias else 0)
                                + Bp * M * Np + Bp * M) * itemsize),
        ),
    )(*operands)
    return out[:B, :M]


# ---------------------------------------------------------------------------
# Module wrapper mirroring Linear.forward(x, C=None)
# ---------------------------------------------------------------------------
def linear_module_forward(x, weight, bias, C=None):
    # TODO(synk): AbstractElement inputs (x.linear(...)) not supported here.
    if C is None:
        return linear_forward(x, weight, bias)
    return linear_bmm_forward(x, weight, bias, C)


if __name__ == "__main__":
    key = jax.random.PRNGKey(0)
    kx, kw, kb, kc = jax.random.split(key, 4)

    # --- small shapes matching the module's intended use ---------------------
    batch, in_features, out_features, M = 8, 32, 64, 16

    x = jax.random.normal(kx, (batch, in_features), dtype=jnp.float32)
    bound = 1.0 / jnp.sqrt(in_features)
    weight = jax.random.uniform(
        kw, (out_features, in_features), dtype=jnp.float32,
        minval=-bound, maxval=bound)
    bias = jax.random.uniform(
        kb, (out_features,), dtype=jnp.float32, minval=-bound, maxval=bound)
    C = jax.random.normal(kc, (batch, M, out_features), dtype=jnp.float32)

    # Path 1: C is None  ->  y = x @ W.T + b
    y = jax.block_until_ready(linear_module_forward(x, weight, bias, C=None))
    y_ref = jnp.einsum("bk,nk->bn", x, weight,
                       precision=lax.Precision.HIGHEST) + bias
    assert y.shape == (batch, out_features)
    assert jnp.allclose(y, y_ref, atol=1e-5, rtol=1e-5)

    # Path 1b: no bias (bias=None branch skips the bias stream entirely)
    y_nb = jax.block_until_ready(linear_module_forward(x, weight, None, C=None))
    y_nb_ref = jnp.einsum("bk,nk->bn", x, weight,
                          precision=lax.Precision.HIGHEST)
    assert jnp.allclose(y_nb, y_nb_ref, atol=1e-5, rtol=1e-5)

    # Path 2: with C  ->  bmm(C, y.unsqueeze(-1)).squeeze(-1)
    z = jax.block_until_ready(linear_module_forward(x, weight, bias, C=C))
    z_ref = jnp.einsum("bmn,bn->bm", C, y_ref,
                       precision=lax.Precision.HIGHEST)
    assert z.shape == (batch, M)
    assert jnp.allclose(z, z_ref, atol=1e-4, rtol=1e-4)

    # --- a larger shape to exercise multi-tile grid / resident-x K slicing ---
    k2 = jax.random.split(key, 8)
    B2, K2, N2, M2 = 160, 1152, 1280, 24
    x2 = jax.random.normal(k2[0], (B2, K2), dtype=jnp.float32)
    b2d = 1.0 / jnp.sqrt(K2)
    w2 = jax.random.uniform(k2[1], (N2, K2), dtype=jnp.float32,
                            minval=-b2d, maxval=b2d)
    bi2 = jax.random.uniform(k2[2], (N2,), dtype=jnp.float32,
                             minval=-b2d, maxval=b2d)
    C2 = jax.random.normal(k2[3], (B2, M2, N2), dtype=jnp.float32)

    y2 = jax.block_until_ready(linear_module_forward(x2, w2, bi2, C=None))
    y2_ref = jnp.einsum("bk,nk->bn", x2, w2,
                        precision=lax.Precision.HIGHEST) + bi2
    assert jnp.allclose(y2, y2_ref, atol=2e-3, rtol=2e-3)

    z2 = jax.block_until_ready(linear_module_forward(x2, w2, bi2, C=C2))
    z2_ref = jnp.einsum("bmn,bn->bm", C2, y2_ref,
                        precision=lax.Precision.HIGHEST)
    assert jnp.allclose(z2, z2_ref, atol=2e-3, rtol=2e-3)

    print("KERNEL_OK")
</pallas_src>

<mosaic_0001>
module attributes {stable_mosaic.version = 11 : i64} {
  func.func @kernel(%arg0: i32, %arg1: i32, %arg2: i32, %arg3: memref<8x128xf32, #tpu.memory_space<vmem>>, %arg4: memref<128x128xf32, #tpu.memory_space<vmem>>, %arg5: memref<1x128xf32, #tpu.memory_space<vmem>>, %arg6: memref<8x128xf32, #tpu.memory_space<vmem>>) attributes {dimension_semantics = [#tpu.dimension_semantics<parallel>, #tpu.dimension_semantics<parallel>, #tpu.dimension_semantics<arbitrary>], iteration_bounds = array<i64: 1, 1, 1>, scalar_prefetch = 0 : i64, scratch_operands = 0 : i64, tpu.core_type = #tpu.core_type<tc>, window_params = [{transform_indices = @transform_0, window_bounds = array<i64: 8, 128>}, {transform_indices = @transform_1, window_bounds = array<i64: 128, 128>}, {transform_indices = @transform_2, window_bounds = array<i64: 1, 128>}, {transform_indices = @transform_3, window_bounds = array<i64: 8, 128>}]} {
    %c0_i32 = arith.constant 0 : i32
    %0 = arith.cmpi eq, %arg2, %c0_i32 : i32
    %1 = arith.extui %0 : i1 to i32
    %c0_i32_0 = arith.constant 0 : i32
    %2 = arith.cmpi ne, %1, %c0_i32_0 : i32
    scf.if %2 {
      %cst_9 = arith.constant 0.000000e+00 : f32
      %15 = vector.broadcast %cst_9 : f32 to vector<8x128xf32>
      %c0_10 = arith.constant 0 : index
      %c0_11 = arith.constant 0 : index
      %16 = vector.load %arg6[%c0_10, %c0_11] : memref<8x128xf32, #tpu.memory_space<vmem>>, vector<8x128xf32>
      tpu.vector_store %arg6[%c0_10, %c0_11], %15 {strides = array<i32>} : memref<8x128xf32, #tpu.memory_space<vmem>>, vector<8x128xf32>,
    } else {
    }
    %c128_i32 = arith.constant 128 : i32
    %3 = arith.muli %arg2, %c128_i32 : i32
    %4 = tpu.assume_multiple %3, 128 : i32
    %c0 = arith.constant 0 : index
    %5 = arith.index_cast %4 : i32 to index
    %6 = vector.load %arg3[%c0, %5] : memref<8x128xf32, #tpu.memory_space<vmem>>, vector<8x128xf32>
    %c0_1 = arith.constant 0 : index
    %c0_2 = arith.constant 0 : index
    %7 = vector.load %arg6[%c0_1, %c0_2] : memref<8x128xf32, #tpu.memory_space<vmem>>, vector<8x128xf32>
    %c0_3 = arith.constant 0 : index
    %c0_4 = arith.constant 0 : index
    %8 = vector.load %arg4[%c0_3, %c0_4] : memref<128x128xf32, #tpu.memory_space<vmem>>, vector<128x128xf32>
    %cst = arith.constant dense<0.000000e+00> : vector<8x128xf32>
    %9 = tpu.matmul %6, %8, %cst {dimension_numbers = #tpu.dot_dimension_numbers<[1], [1], [0], [0], [0, 0, 1, 0], [], []>} : vector<8x128xf32>, vector<128x128xf32>, vector<8x128xf32> -> vector<8x128xf32>
    %10 = arith.addf %7, %9 : vector<8x128xf32>
    %c0_5 = arith.constant 0 : index
    %c0_6 = arith.constant 0 : index
    %11 = vector.load %arg6[%c0_5, %c0_6] : memref<8x128xf32, #tpu.memory_space<vmem>>, vector<8x128xf32>
    tpu.vector_store %arg6[%c0_5, %c0_6], %10 {strides = array<i32>} : memref<8x128xf32, #tpu.memory_space<vmem>>, vector<8x128xf32>,
    %c0_i32_7 = arith.constant 0 : i32
    %12 = arith.cmpi eq, %arg2, %c0_i32_7 : i32
    %13 = arith.extui %12 : i1 to i32
    %c0_i32_8 = arith.constant 0 : i32
    %14 = arith.cmpi ne, %13, %c0_i32_8 : i32
    scf.if %14 {
      %c0_9 = arith.constant 0 : index
      %c0_10 = arith.constant 0 : index
      %15 = vector.load %arg6[%c0_9, %c0_10] : memref<8x128xf32, #tpu.memory_space<vmem>>, vector<8x128xf32>
      %c0_11 = arith.constant 0 : index
      %c0_12 = arith.constant 0 : index
      %16 = vector.load %arg5[%c0_11, %c0_12] : memref<1x128xf32, #tpu.memory_space<vmem>>, vector<1x128xf32>
      %17 = vector.broadcast %16 : vector<1x128xf32> to vector<8x128xf32>
      %18 = arith.addf %15, %17 : vector<8x128xf32>
      %c0_13 = arith.constant 0 : index
      %c0_14 = arith.constant 0 : index
      %19 = vector.load %arg6[%c0_13, %c0_14] : memref<8x128xf32, #tpu.memory_space<vmem>>, vector<8x128xf32>
      tpu.vector_store %arg6[%c0_13, %c0_14], %18 {strides = array<i32>} : memref<8x128xf32, #tpu.memory_space<vmem>>, vector<8x128xf32>,
    } else {
    }
    return
  }
  func.func @transform_0(%arg0: i32, %arg1: i32, %arg2: i32) -> (i32, i32) {
    %c0_i32 = arith.constant 0 : i32
    %c0_i32_0 = arith.constant 0 : i32
    return %arg0, %c0_i32 : i32, i32
  }
  func.func @transform_1(%arg0: i32, %arg1: i32, %arg2: i32) -> (i32, i32) {
    %c0_i32 = arith.constant 0 : i32
    return %arg1, %arg2 : i32, i32
  }
  func.func @transform_2(%arg0: i32, %arg1: i32, %arg2: i32) -> (i32, i32) {
    %c0_i32 = arith.constant 0 : i32
    %c0_i32_0 = arith.constant 0 : i32
    return %c0_i32, %arg1 : i32, i32
  }
  func.func @transform_3(%arg0: i32, %arg1: i32, %arg2: i32) -> (i32, i32) {
    %c0_i32 = arith.constant 0 : i32
    return %arg0, %arg1 : i32, i32
  }
}

</mosaic_0001>

<bundles_post_ra>
// kernel: tpu_custom_call.1
= control target key start
LH: loop header
LB: loop body
LE: loop exit
PB: predicated region body
PF: predicated region fallthrough
CT: control target
= control target key end

     0   :  { %8 = vsyncpa [#allocation3], 0  ;;  %s245_s0 = inlined_call_operand.hbm [shape: f32[8,128], index: 0, kind: input, shape index: {}]   ;;  %s246_s1 = inlined_call_operand.hbm [shape: f32[128,128], index: 1, kind: input, shape index: {}]   ;;  %s247_s2 = inlined_call_operand.vmem [shape: f32[1,128], index: 2, kind: input, shape index: {}]   ;;  %s248_s3 = inlined_call_operand.hbm [shape: f32[8,128], index: 3, kind: output, shape index: {}]  }
   0x1   :  { %9 = vsyncpa [#allocation6], 0 }
   0x2   :  { %10 = vsyncpa [#allocation4], 0  ;;  %s16_s14 = sshll.u32 %s245_s0, 4  ;;  %s208_s15 = smov [#allocation2]   ;;  %s17_s14 = int_to_ptr.hbm [resolvable:$true] %s16_s14 }
   0x3   :  { %s18_s16 = sshll.u32 %s208_s15, 4  ;;  %s26_s19 = sshll.u32 %s246_s1, 4  ;;  %s19_s16 = int_to_ptr.vmem [resolvable:$true] %s18_s16  ;;  %s27_s19 = int_to_ptr.hbm [resolvable:$true] %s26_s19 }
   0x4   :  { %21 = dma.hbm_to_vmem [thread:$0]  %s17_s14, 128, %s19_s16, [#allocation3]  }
   0x5   :  { %s209_s20 = smov [#allocation5]   ;;  %s210_s22 = smov 128  }
   0x6   :  { %s28_s21 = sshll.u32 %s209_s20, 4  ;;  %s211_s23 = smov 8   ;;  %s29_s21 = int_to_ptr.vmem [resolvable:$true] %s28_s21 }
   0x7   :  { %34 = dma.hbm_to_vmem [thread:$0]  %s27_s19, 2048, %s29_s21, [#allocation6], %s210_s22, %s210_s22, %s211_s23  }
   0x8   :  { %202 = dma.done.wait [#allocation3], 128  }
   0x9   :  { %203 = vsyncadd [#allocation3], 4294967168 }
   0xa   :  { %204 = dma.done.wait [#allocation6], 2048  }
   0xb   :  { %205 = vsyncadd [#allocation6], 4294965248  ;;  %v71_v0 = vld [vmem:[#allocation5 + $0x78] sm:$0xff]  ;;  %v70_v1 = vld [vmem:[#allocation5 + $0x70] sm:$0xff]  ;;  %s212_s24 = smov [#allocation7]   ;;  %s111_s28 = sshll.u32 %s248_s3, 4  ;;  %s112_s28 = int_to_ptr.hbm [resolvable:$true] %s111_s28 }
   0xc   :  { %72 = vmatpush.xpose.msra.mxu0 %v71_v0  ;;  %v69_v2 = vld [vmem:[#allocation5 + $0x68] sm:$0xff]  ;;  %v68_v3 = vld [vmem:[#allocation5 + $0x60] sm:$0xff]  ;;  %v67_v4 = vld [vmem:[#allocation5 + $0x58] sm:$0xff]  ;;  %s109_s25 = sshll.u32 %s212_s24, 4  ;;  %s110_s25 = int_to_ptr.vmem [resolvable:$true] %s109_s25 }
   0xd   :  { %v66_v5 = vld [vmem:[#allocation5 + $0x50] sm:$0xff]  ;;  %v65_v6 = vld [vmem:[#allocation5 + $0x48] sm:$0xff]  ;;  %v64_v7 = vld [vmem:[#allocation5 + $0x40] sm:$0xff] }
   0xe   :  { %v63_v8 = vld [vmem:[#allocation5 + $0x38] sm:$0xff]  ;;  %v62_v9 = vld [vmem:[#allocation5 + $0x30] sm:$0xff]  ;;  %v61_v10 = vld [vmem:[#allocation5 + $0x28] sm:$0xff] }
   0xf   :  { %v60_v11 = vld [vmem:[#allocation5 + $0x20] sm:$0xff]  ;;  %v59_v12 = vld [vmem:[#allocation5 + $0x18] sm:$0xff]  ;;  %v58_v13 = vld [vmem:[#allocation5 + $0x10] sm:$0xff] }
  0x10   :  { %73 = vmatpush.xpose.msra.mxu0 %v70_v1  ;;  %v57_v14 = vld [vmem:[#allocation5 + $0x8] sm:$0xff]  ;;  %v56_v15 = vld [vmem:[#allocation5] sm:$0xff]  ;;  %v54_v16 = vld [vmem:[#allocation2] sm:$0xff] }
  0x11   :  { %v129_v17 = vld [vmem:[%s247_s2] ss:$0 sm:$0xff] }
  0x14   :  { %74 = vmatpush.xpose.msra.mxu0 %v69_v2 }
  0x18   :  { %75 = vmatpush.xpose.msra.mxu0 %v68_v3 }
  0x1c   :  { %76 = vmatpush.xpose.msra.mxu0 %v67_v4 }
  0x20   :  { %77 = vmatpush.xpose.msra.mxu0 %v66_v5 }
  0x24   :  { %78 = vmatpush.xpose.msra.mxu0 %v65_v6 }
  0x28   :  { %79 = vmatpush.xpose.msra.mxu0 %v64_v7 }
  0x2c   :  { %80 = vmatpush.xpose.msra.mxu0 %v63_v8 }
  0x30   :  { %81 = vmatpush.xpose.msra.mxu0 %v62_v9 }
  0x34   :  { %82 = vmatpush.xpose.msra.mxu0 %v61_v10 }
  0x38   :  { %83 = vmatpush.xpose.msra.mxu0 %v60_v11 }
  0x3c   :  { %84 = vmatpush.xpose.msra.mxu0 %v59_v12 }
  0x40   :  { %85 = vmatpush.xpose.msra.mxu0 %v58_v13 }
  0x44   :  { %86 = vmatpush.xpose.msra.mxu0 %v57_v14 }
  0x48   :  { %87 = vmatpush.xpose.msra.mxu0 %v56_v15 }
  0x4b   :  { %88 = vmatmul.f32.vlgmr.msra.gmra.mxu0 %v54_v16 }
  0xc8   :  { %v89_v18 = vpop.f32.mrf.mxu0 }
  0xc9   :  { %v102_v19 = vadd.f32 %v129_v17, %v89_v18 }
  0xcb   :  { %103 = vst [vmem:[#allocation7] sm:$0xff] %v102_v19 }
  0xcc   :  { %114 = dma.vmem_to_hbm [thread:$0]  %s110_s25, 128, %s112_s28, [#allocation4]  }
  0xcd   :  { %206 = dma.done.wait [#allocation4], 128  }
  0xce   :  { %207 = vsyncadd [#allocation4], 4294967168 }
  0xcf   :  { %119 = vsyncpa [#allocation3], 1 }
  0xd0   :  { %120 = vsyncpa [#allocation6], 1 }
  0xd1   :  { %121 = vsyncpa [#allocation4], 1 }

</bundles_post_ra>
